<compile_context>
chip_gen: v6e
topology: v6e:2x2x1
jax: 0.10.0
libtpu: 0.0.40
codegen_flags: <defaults>
</compile_context>

<pallas_src>
import jax
import jax.numpy as jnp
from jax.experimental import pallas as pl
from jax.experimental.pallas import tpu as pltpu


def generator_kernel(z_ref, l_ref, w1z_ref, w1l_ref, b1_ref, w2t_ref, b2_ref, ot_ref):
    """Fused MLP forward for one batch tile, written lane-dense as (2, TILE_B).

    z_ref  : (TILE_B, z_dim)      bf16
    l_ref  : (TILE_B, label_dim)  bf16
    w1z_ref: (z_dim, hidden)      bf16
    w1l_ref: (label_dim, hidden)  bf16
    b1_ref : (1, hidden)          f32
    w2t_ref: (2, hidden)          bf16   (W2 transposed)
    b2_ref : (2, 1)               f32
    ot_ref : (2, TILE_B)          f32    (output, transposed)
    """
    # Hoist bias reads / broadcasts once per grid step.
    b1 = b1_ref[...]                       # (1, H)  f32
    b2 = b2_ref[...]                       # (2, 1)  f32

    # bf16 only on the wire; upcast for f32 compute (matches PyTorch math, and
    # keeps VPU elementwise work in f32 which is required on v5e anyway).
    z = z_ref[...].astype(jnp.float32)
    l = l_ref[...].astype(jnp.float32)
    w1z = w1z_ref[...].astype(jnp.float32)
    w1l = w1l_ref[...].astype(jnp.float32)
    w2t = w2t_ref[...].astype(jnp.float32)

    # First layer: split-K matmul replaces the wrapper-side concat.
    h = jnp.dot(z, w1z, preferred_element_type=jnp.float32)
    h = h + jnp.dot(l, w1l, preferred_element_type=jnp.float32)
    h = jnp.maximum(h + b1, 0.0)           # (TILE_B, H) f32, ReLU on the VPU

    # Second layer, lane-dense: (2, H) x (TILE_B, H)^T -> (2, TILE_B).
    out_t = jax.lax.dot_general(
        w2t, h,
        dimension_numbers=(((1,), (1,)), ((), ())),
        preferred_element_type=jnp.float32,
    ) + b2
    ot_ref[...] = out_t.astype(ot_ref.dtype)


def _round_up(n, m):
    return ((n + m - 1) // m) * m


def generator_forward(z, label_onehot, w1, b1, w2, b2, *, tile_b=512):
    """Equivalent of Generator.forward(z, label_onehot).

    z            : (B, z_dim)        f32
    label_onehot : (B, label_dim)    f32
    w1           : (z_dim+label_dim, hidden)   (x @ W1 layout, i.e. PyTorch W1.T)
    b1           : (1, hidden)
    w2           : (hidden, 2)
    b2           : (1, 2)
    returns      : (B, 2) f32
    """
    B, z_dim = z.shape
    label_dim = label_onehot.shape[1]
    hidden = w1.shape[1]

    # Pick the batch tile: big streaming tiles for large B, a single tight tile
    # (rounded to a sublane multiple of 8) for small B.
    if B <= tile_b:
        tile = _round_up(max(B, 1), 8)
        b_pad = tile
    else:
        tile = tile_b                       # multiple of 128 -> lane-dense output tiles
        b_pad = _round_up(B, tile)
    grid = (b_pad // tile,)

    # bf16 on the wire for the streamed / resident operands.
    z_b = z.astype(jnp.bfloat16)
    l_b = label_onehot.astype(jnp.bfloat16)
    if b_pad != B:
        pad = ((0, b_pad - B), (0, 0))
        z_b = jnp.pad(z_b, pad)
        l_b = jnp.pad(l_b, pad)

    w1z = w1[:z_dim, :].astype(jnp.bfloat16)        # (z_dim, H)
    w1l = w1[z_dim:, :].astype(jnp.bfloat16)        # (label_dim, H)
    w2t = w2.T.astype(jnp.bfloat16)                 # (2, H)
    b1f = b1.reshape(1, hidden).astype(jnp.float32)
    b2f = b2.reshape(2, 1).astype(jnp.float32)      # column bias for (2, TILE_B) tile

    out_t = pl.pallas_call(
        generator_kernel,
        out_shape=jax.ShapeDtypeStruct((2, b_pad), jnp.float32),
        grid=grid,
        in_specs=[
            pl.BlockSpec((tile, z_dim), lambda i: (i, 0)),        # z tile streams
            pl.BlockSpec((tile, label_dim), lambda i: (i, 0)),    # label tile streams
            pl.BlockSpec((z_dim, hidden), lambda i: (0, 0)),      # weights stay resident
            pl.BlockSpec((label_dim, hidden), lambda i: (0, 0)),
            pl.BlockSpec((1, hidden), lambda i: (0, 0)),
            pl.BlockSpec((2, hidden), lambda i: (0, 0)),
            pl.BlockSpec((2, 1), lambda i: (0, 0)),
        ],
        out_specs=pl.BlockSpec((2, tile), lambda i: (0, i)),      # lane-dense output
        compiler_params=pltpu.CompilerParams(
            dimension_semantics=("parallel",),
            vmem_limit_bytes=32 * 1024 * 1024,
        ),
    )(z_b, l_b, w1z, w1l, b1f, w2t, b2f)

    # Cheap layout plumbing back to (B, 2).
    return out_t.T[:B, :]


def init_params(key, z_dim, label_dim, hidden_dim):
    """PyTorch nn.Linear default init: U(-1/sqrt(fan_in), 1/sqrt(fan_in))."""
    d_in = z_dim + label_dim
    k1, k2, k3, k4 = jax.random.split(key, 4)
    bound1 = 1.0 / jnp.sqrt(d_in)
    bound2 = 1.0 / jnp.sqrt(hidden_dim)
    w1 = jax.random.uniform(k1, (d_in, hidden_dim), jnp.float32, -bound1, bound1)
    b1 = jax.random.uniform(k2, (1, hidden_dim), jnp.float32, -bound1, bound1)
    w2 = jax.random.uniform(k3, (hidden_dim, 2), jnp.float32, -bound2, bound2)
    b2 = jax.random.uniform(k4, (1, 2), jnp.float32, -bound2, bound2)
    return w1, b1, w2, b2


def _reference(z, label_onehot, w1, b1, w2, b2):
    # Same math, same bf16-on-the-wire rounding, f32 compute.
    zc = z.astype(jnp.bfloat16).astype(jnp.float32)
    lc = label_onehot.astype(jnp.bfloat16).astype(jnp.float32)
    w1c = w1.astype(jnp.bfloat16).astype(jnp.float32)
    w2c = w2.astype(jnp.bfloat16).astype(jnp.float32)
    x = jnp.concatenate([zc, lc], axis=1)
    return jnp.maximum(x @ w1c + b1, 0.0) @ w2c + b2


if __name__ == "__main__":
    z_dim, label_dim, hidden_dim = 8, 2, 32
    key = jax.random.PRNGKey(0)
    kp, kd = jax.random.split(key)
    w1, b1, w2, b2 = init_params(kp, z_dim, label_dim, hidden_dim)

    ok = True
    # Small batch (single tile) and a larger batch (exercises the pipelined grid path).
    for batch in (8, 1536):
        kz, kl, kd = jax.random.split(kd, 3)
        z = jax.random.normal(kz, (batch, z_dim), jnp.float32)
        labels = jax.random.randint(kl, (batch,), 0, label_dim)
        label_onehot = jax.nn.one_hot(labels, label_dim, dtype=jnp.float32)

        out = generator_forward(z, label_onehot, w1, b1, w2, b2)
        out = jax.block_until_ready(out)

        ref = _reference(z, label_onehot, w1, b1, w2, b2)
        ok &= out.shape == (batch, 2)
        ok &= bool(jnp.allclose(out, ref, atol=1e-4, rtol=1e-4))

    assert ok
    print("KERNEL_OK")
</pallas_src>

<mosaic_0001>
module attributes {stable_mosaic.version = 11 : i64} {
  func.func @generator_kernel(%arg0: i32, %arg1: memref<8x8xbf16, #tpu.memory_space<vmem>>, %arg2: memref<8x2xbf16, #tpu.memory_space<vmem>>, %arg3: memref<8x32xbf16, #tpu.memory_space<vmem>>, %arg4: memref<2x32xbf16, #tpu.memory_space<vmem>>, %arg5: memref<1x32xf32, #tpu.memory_space<vmem>>, %arg6: memref<2x32xbf16, #tpu.memory_space<vmem>>, %arg7: memref<2x1xf32, #tpu.memory_space<vmem>>, %arg8: memref<2x8xf32, #tpu.memory_space<vmem>>) attributes {dimension_semantics = [#tpu.dimension_semantics<parallel>], iteration_bounds = array<i64: 1>, scalar_prefetch = 0 : i64, scratch_operands = 0 : i64, tpu.core_type = #tpu.core_type<tc>, window_params = [{transform_indices = @transform_0, window_bounds = array<i64: 8, 8>}, {transform_indices = @transform_1, window_bounds = array<i64: 8, 2>}, {pipeline_mode = #tpu.pipeline_mode<synchronous>, transform_indices = @transform_2, window_bounds = array<i64: 8, 32>}, {pipeline_mode = #tpu.pipeline_mode<synchronous>, transform_indices = @transform_3, window_bounds = array<i64: 2, 32>}, {pipeline_mode = #tpu.pipeline_mode<synchronous>, transform_indices = @transform_4, window_bounds = array<i64: 1, 32>}, {pipeline_mode = #tpu.pipeline_mode<synchronous>, transform_indices = @transform_5, window_bounds = array<i64: 2, 32>}, {pipeline_mode = #tpu.pipeline_mode<synchronous>, transform_indices = @transform_6, window_bounds = array<i64: 2, 1>}, {transform_indices = @transform_7, window_bounds = array<i64: 2, 8>}]} {
    %c0 = arith.constant 0 : index
    %c0_0 = arith.constant 0 : index
    %0 = vector.load %arg5[%c0, %c0_0] : memref<1x32xf32, #tpu.memory_space<vmem>>, vector<1x32xf32>
    %c0_1 = arith.constant 0 : index
    %c0_2 = arith.constant 0 : index
    %1 = vector.load %arg7[%c0_1, %c0_2] : memref<2x1xf32, #tpu.memory_space<vmem>>, vector<2x1xf32>
    %c0_3 = arith.constant 0 : index
    %c0_4 = arith.constant 0 : index
    %2 = vector.load %arg1[%c0_3, %c0_4] : memref<8x8xbf16, #tpu.memory_space<vmem>>, vector<8x8xbf16>
    %3 = arith.extf %2 : vector<8x8xbf16> to vector<8x8xf32>
    %c0_5 = arith.constant 0 : index
    %c0_6 = arith.constant 0 : index
    %4 = vector.load %arg2[%c0_5, %c0_6] : memref<8x2xbf16, #tpu.memory_space<vmem>>, vector<8x2xbf16>
    %5 = arith.extf %4 : vector<8x2xbf16> to vector<8x2xf32>
    %c0_7 = arith.constant 0 : index
    %c0_8 = arith.constant 0 : index
    %6 = vector.load %arg3[%c0_7, %c0_8] : memref<8x32xbf16, #tpu.memory_space<vmem>>, vector<8x32xbf16>
    %7 = arith.extf %6 : vector<8x32xbf16> to vector<8x32xf32>
    %c0_9 = arith.constant 0 : index
    %c0_10 = arith.constant 0 : index
    %8 = vector.load %arg4[%c0_9, %c0_10] : memref<2x32xbf16, #tpu.memory_space<vmem>>, vector<2x32xbf16>
    %9 = arith.extf %8 : vector<2x32xbf16> to vector<2x32xf32>
    %c0_11 = arith.constant 0 : index
    %c0_12 = arith.constant 0 : index
    %10 = vector.load %arg6[%c0_11, %c0_12] : memref<2x32xbf16, #tpu.memory_space<vmem>>, vector<2x32xbf16>
    %11 = arith.extf %10 : vector<2x32xbf16> to vector<2x32xf32>
    %cst = arith.constant dense<0.000000e+00> : vector<8x32xf32>
    %12 = tpu.matmul %3, %7, %cst {dimension_numbers = #tpu.dot_dimension_numbers<[1], [0], [0], [1], [0, 0, 1, 1], [], []>} : vector<8x8xf32>, vector<8x32xf32>, vector<8x32xf32> -> vector<8x32xf32>
    %cst_13 = arith.constant dense<0.000000e+00> : vector<8x32xf32>
    %13 = tpu.matmul %5, %9, %cst_13 {dimension_numbers = #tpu.dot_dimension_numbers<[1], [0], [0], [1], [0, 0, 1, 1], [], []>} : vector<8x2xf32>, vector<2x32xf32>, vector<8x32xf32> -> vector<8x32xf32>
    %14 = arith.addf %12, %13 : vector<8x32xf32>
    %15 = vector.broadcast %0 : vector<1x32xf32> to vector<8x32xf32>
    %16 = arith.addf %14, %15 : vector<8x32xf32>
    %cst_14 = arith.constant 0.000000e+00 : f32
    %17 = vector.broadcast %cst_14 : f32 to vector<8x32xf32>
    %18 = arith.maximumf %16, %17 : vector<8x32xf32>
    %cst_15 = arith.constant dense<0.000000e+00> : vector<2x8xf32>
    %19 = tpu.matmul %11, %18, %cst_15 {dimension_numbers = #tpu.dot_dimension_numbers<[1], [1], [0], [0], [0, 0, 1, 0], [], []>} : vector<2x32xf32>, vector<8x32xf32>, vector<2x8xf32> -> vector<2x8xf32>
    %20 = vector.broadcast %1 : vector<2x1xf32> to vector<2x8xf32>
    %21 = arith.addf %19, %20 : vector<2x8xf32>
    %c0_16 = arith.constant 0 : index
    %c0_17 = arith.constant 0 : index
    %22 = vector.load %arg8[%c0_16, %c0_17] : memref<2x8xf32, #tpu.memory_space<vmem>>, vector<2x8xf32>
    tpu.vector_store %arg8[%c0_16, %c0_17], %21 {strides = array<i32>} : memref<2x8xf32, #tpu.memory_space<vmem>>, vector<2x8xf32>,
    return
  }
  func.func @transform_0(%arg0: i32) -> (i32, i32) {
    %c0_i32 = arith.constant 0 : i32
    %c0_i32_0 = arith.constant 0 : i32
    return %arg0, %c0_i32 : i32, i32
  }
  func.func @transform_1(%arg0: i32) -> (i32, i32) {
    %c0_i32 = arith.constant 0 : i32
    %c0_i32_0 = arith.constant 0 : i32
    return %arg0, %c0_i32 : i32, i32
  }
  func.func @transform_2(%arg0: i32) -> (i32, i32) {
    %c0_i32 = arith.constant 0 : i32
    %c0_i32_0 = arith.constant 0 : i32
    %c0_i32_1 = arith.constant 0 : i32
    return %c0_i32, %c0_i32_0 : i32, i32
  }
  func.func @transform_3(%arg0: i32) -> (i32, i32) {
    %c0_i32 = arith.constant 0 : i32
    %c0_i32_0 = arith.constant 0 : i32
    %c0_i32_1 = arith.constant 0 : i32
    return %c0_i32, %c0_i32_0 : i32, i32
  }
  func.func @transform_4(%arg0: i32) -> (i32, i32) {
    %c0_i32 = arith.constant 0 : i32
    %c0_i32_0 = arith.constant 0 : i32
    %c0_i32_1 = arith.constant 0 : i32
    return %c0_i32, %c0_i32_0 : i32, i32
  }
  func.func @transform_5(%arg0: i32) -> (i32, i32) {
    %c0_i32 = arith.constant 0 : i32
    %c0_i32_0 = arith.constant 0 : i32
    %c0_i32_1 = arith.constant 0 : i32
    return %c0_i32, %c0_i32_0 : i32, i32
  }
  func.func @transform_6(%arg0: i32) -> (i32, i32) {
    %c0_i32 = arith.constant 0 : i32
    %c0_i32_0 = arith.constant 0 : i32
    %c0_i32_1 = arith.constant 0 : i32
    return %c0_i32, %c0_i32_0 : i32, i32
  }
  func.func @transform_7(%arg0: i32) -> (i32, i32) {
    %c0_i32 = arith.constant 0 : i32
    %c0_i32_0 = arith.constant 0 : i32
    return %c0_i32, %arg0 : i32, i32
  }
}

</mosaic_0001>

<bundles_post_ra>
// kernel: tpu_custom_call.1
= control target key start
LH: loop header
LB: loop body
LE: loop exit
PB: predicated region body
PF: predicated region fallthrough
CT: control target
= control target key end

     0   :  { %vm43_vm0 = vcmask 1041408   ;;  %vm39_vm1 = vcmask 15360   ;;  %v351_v1 = vmov 0.0   ;;  %vm352_vm2 = vmmov 0   ;;  %s421_s0 = inlined_call_operand.vmem [shape: bf16[8,8], index: 0, kind: input, shape index: {}]   ;;  %s422_s1 = inlined_call_operand.vmem [shape: bf16[8,2], index: 1, kind: input, shape index: {}]   ;;  %s423_s2 = inlined_call_operand.vmem [shape: bf16[8,32], index: 2, kind: input, shape index: {}]   ;;  %s424_s3 = inlined_call_operand.vmem [shape: bf16[2,32], index: 3, kind: input, shape index: {}]   ;;  %s425_s4 = inlined_call_operand.vmem [shape: f32[1,32], index: 4, kind: input, shape index: {}]   ;;  %s426_s5 = inlined_call_operand.vmem [shape: bf16[2,32], index: 5, kind: input, shape index: {}]   ;;  %s427_s6 = inlined_call_operand.vmem [shape: f32[2,1], index: 6, kind: input, shape index: {}]   ;;  %s428_s7 = inlined_call_operand.hbm [shape: f32[2,8], index: 7, kind: output, shape index: {}]  }
   0x1   :  { %v35_v0 = vld [vmem:[%s424_s3] sm:$0x1]  ;;  %309 = vmatprep.subr.mxu0 %v351_v1  ;;  %314 = vmatprep.subr.mxu1 %v351_v1  ;;  %vm117_vm3 = vcmask 64512  }
   0x2   :  { %v36_v2 = vunpack.c.l.bf16 %v35_v0  ;;  %v33_v3 = vld [vmem:[%s423_s2] sm:$0xf]  ;;  %311 = vmatprep.mubr.msk.f32.mxu0 %vm352_vm2, %v351_v1  ;;  %316 = vmatprep.mubr.msk.f32.mxu1 %vm352_vm2, %v351_v1 }
   0x3   :  { %v31_v4 = vld [vmem:[%s422_s1] sm:$0xf]  ;;  %v34_v6 = vunpack.c.l.bf16 %v33_v3 }
   0x4   :  { %v29_v5 = vld [vmem:[%s421_s0] sm:$0xf]  ;;  %v32_v7 = vunpack.c.l.bf16 %v31_v4 }
   0x5   :  { %v30_v8 = vunpack.c.l.bf16 %v29_v5 }
   0x6   :  { %12 = vsyncpa [#allocation3], 0  ;;  %310 = vmatpush3.msk.msra.mxu0 %vm43_vm0, %v36_v2  ;;  %315 = vmatpush3.msra.mxu1 %v34_v6  ;;  %v28_v9 = vld [vmem:[%s427_s6] sm:$0x3]  ;;  %v353_v10 = vmov 0   ;;  %vm204_vm4 = vcmask 261120  }
   0x7   :  { %312 = vmatmul.mubr.msk.f32.vlgmr.msra.gmra.mxu0 %vm39_vm1, %v32_v7  ;;  %317 = vmatmul.mubr.msk.f32.vlgmr.msra.gmra.mxu1 %vm117_vm3, %v30_v8  ;;  %v300_v12 = vld [vmem:[%s425_s4] ss:$0 sm:$0xff]  ;;  %s354_s6 = smov [#allocation2]   ;;  %vm281_vm5 = vcmask 58368  }
   0x8   :  { %319 = vmatprep.subr.mxu0 %v351_v1  ;;  %321 = vmatprep.mubr.msk.f32.mxu0 %vm352_vm2, %v351_v1  ;;  %v37_v18 = vld [vmem:[%s426_s5] sm:$0x1]  ;;  %s289_s11 = sshll.u32 %s354_s6, 4  ;;  %s290_s11 = int_to_ptr.vmem [resolvable:$true] %s289_s11 }
   0x9   :  { %328 = vset.pattern.permute.xlu0 %v353_v10  ;;  %v38_v20 = vunpack.c.l.bf16 %v37_v18  ;;  %s329_s4 = scalar_lea.vmem %s290_s11, 32  ;;  %p334_p1 = scmp.lt.s32.totalorder %s290_s11, %s290_s11 }
   0xa   :  { %201 = vperm.xlu0 %328, %v28_v9   ;;  %p330_p0 = scmp.ne.s32.totalorder %s290_s11, %s329_s4  ;;  %p335_p2 = scmp.lt.s32.totalorder %s329_s4, %s329_s4 }
   0xc   :  { %p336_p3 = por %p335_p2, %p334_p1 }
   0xe   :  { %p337_p4 = pnand %p336_p3, %p330_p0 }
  0x85   :  { %v202_v21 = vpop.permute.xlu0 %201 }
  0xc7   :  { %v113_v11 = vpop.f32.mrf.mxu0  ;;  %v187_v13 = vpop.f32.mrf.mxu1 }
  0xc8   :  { %v188_v14 = vadd.f32 %v187_v13, %v113_v11 }
  0xc9   :  { %v313_v15 = vpop.f32.mrf.mxu0  ;;  %v318_v16 = vpop.f32.mrf.mxu1 }
  0xca   :  { %v197_v17 = vadd.f32 %v300_v12, %v188_v14 }
  0xcc   :  { %v198_v19 = vmax.f32 %v197_v17, 0.0 }
  0xce   :  { %320 = vmatpush3.xpose.msk.msra.mxu0 %vm204_vm4, %v198_v19 }
  0xd1   :  { %322 = vmatmul.mubr.msk.f32.vlgmr.msra.gmra.mxu0 %vm204_vm4, %v38_v20 }
 0x191   :  { %v277_v22 = vpop.f32.mrf.mxu0 }
 0x192   :  { %v278_v23 = vadd.f32 %v277_v22, %v202_v21 }
 0x193   :  { %v323_v24 = vpop.f32.mrf.mxu0 }
 0x194   :  { %282 = vst.msk [vmem:[#allocation2] sm:$0x3] %vm281_vm5, %v278_v23 }
 0x195   :  { %340 = shalt.err (!%p337_p4)
}
 0x196   :  { %292 = dma.vmem_to_hbm [thread:$0]  %s290_s11, 32, %s428_s7, [#allocation3]  }
 0x197   :  { %349 = dma.done.wait [#allocation3], 32  }
 0x198   :  { %350 = vsyncadd [#allocation3], 4294967264 }
 0x199   :  { %296 = vsyncpa [#allocation3], 1 }

</bundles_post_ra>
